<compile_context>
chip_gen: v7x
topology: tpu7x:2x2x1
jax: 0.10.0
libtpu: 0.0.40
codegen_flags: <defaults>
</compile_context>

<pallas_src>
import jax
import jax.numpy as jnp
from jax.experimental import pallas as pl
from jax.experimental.pallas import tpu as pltpu


# ---------------------------------------------------------------------------
# Kernel
# ---------------------------------------------------------------------------

def _interp_nearest2x_kernel(x_ref, o_ref):
    # x_ref: (TC, TH, W) -> o_ref: (TC, TH, 4W)
    # Each output super-row packs the two identical upsampled rows (2h, 2h+1)
    # back-to-back along the lane axis.
    x = x_ref[...]
    y = jnp.repeat(x, 2, axis=-1)                    # column doubling: (TC, TH, 2W)
    o_ref[...] = jnp.concatenate([y, y], axis=-1)    # row doubling, lane-packed: (TC, TH, 4W)


# ---------------------------------------------------------------------------
# Block sizing (padding-aware, generation-safe)
# ---------------------------------------------------------------------------

_VMEM_LIMIT_BYTES = 32 * 1024 * 1024     # within scoped VMEM on v5e/v6e/v7x
_VMEM_HEADROOM = 4 * 1024 * 1024
_MIN_GRID_STEPS = 4                      # >= 2 * num TensorCores on v7x


def _round_up(x: int, m: int) -> int:
    return ((x + m - 1) // m) * m


def _sublane(dtype) -> int:
    # Sublane packing multiple: 8 for 32-bit, 16 for 16-bit, 32 for 8-bit.
    return max(8, 32 // jnp.dtype(dtype).itemsize)


def _block_vmem_bytes(tc: int, th: int, w: int, dtype) -> int:
    """Double-buffered VMEM footprint of one (tc,th,w) input block plus its
    (tc,th,4w) output block, with (sublane, 128-lane) padding of the last two
    dims."""
    itemsize = jnp.dtype(dtype).itemsize
    sub = _sublane(dtype)
    th_p = _round_up(th, sub)
    w_in = _round_up(w, 128)
    w_out = _round_up(4 * w, 128)
    return 2 * tc * th_p * (w_in + w_out) * itemsize


def _choose_block(p: int, h: int, w: int, dtype):
    """Pick (TC, TH): fused-plane channels per block and rows per block."""
    budget = _VMEM_LIMIT_BYTES - _VMEM_HEADROOM

    # Keep at least _MIN_GRID_STEPS grid steps when P allows, so the second
    # v7x TensorCore has work and the pipeline actually overlaps DMA/compute.
    tc_cap = max(1, p // _MIN_GRID_STEPS)

    per_chan = _block_vmem_bytes(1, h, w, dtype)
    if per_chan <= budget:
        tc = max(1, min(tc_cap, budget // per_chan))
        return tc, h

    # A single full plane does not fit: tile H in sublane-multiple chunks.
    sub = _sublane(dtype)
    per_group = _block_vmem_bytes(1, sub, w, dtype)
    th = max(sub, (budget // max(per_group, 1)) * sub)
    return 1, min(h, th)


# ---------------------------------------------------------------------------
# Wrapper
# ---------------------------------------------------------------------------

def interpolate_nearest_2x(x: jnp.ndarray) -> jnp.ndarray:
    """Nearest-neighbor 2x upsampling on NCHW input via a Pallas TPU kernel."""
    N, C, H, W = x.shape
    OH, OW = 2 * H, 2 * W
    P = N * C

    xf = x.reshape(P, H, W)                      # free contiguous reshape

    TC, TH = _choose_block(P, H, W, x.dtype)
    grid = (pl.cdiv(P, TC), pl.cdiv(H, TH))      # masked tail blocks, no divisor collapse

    itemsize = jnp.dtype(x.dtype).itemsize
    cost = pl.CostEstimate(
        flops=0,
        transcendentals=0,
        bytes_accessed=5 * P * H * W * itemsize,  # read 1x, write 4x
    )

    out_packed = pl.pallas_call(
        _interp_nearest2x_kernel,
        out_shape=jax.ShapeDtypeStruct((P, H, 4 * W), x.dtype),
        grid_spec=pltpu.PrefetchScalarGridSpec(
            num_scalar_prefetch=0,
            grid=grid,
            in_specs=[pl.BlockSpec((TC, TH, W), lambda p, h: (p, h, 0))],
            out_specs=pl.BlockSpec((TC, TH, 4 * W), lambda p, h: (p, h, 0)),
        ),
        compiler_params=pltpu.CompilerParams(
            dimension_semantics=("parallel", "parallel"),
            vmem_limit_bytes=_VMEM_LIMIT_BYTES,
        ),
        cost_estimate=cost,
    )(xf)

    # Each (H, 4W) super-row holds output rows (2h, 2h+1) back-to-back, so the
    # reshape to (N, C, 2H, 2W) is exact and contiguous (no data movement).
    return out_packed.reshape(N, C, OH, OW)


class Interpolate:
    """JAX/Pallas counterpart of the PyTorch Interpolate module."""

    def __init__(self, size=None, scale_factor=2, mode="nearest",
                 align_corners=False):
        assert mode == "nearest" and size is None and scale_factor in (2, 2.0), (
            "Only the AlbuNet decoder configuration (nearest, scale_factor=2) "
            "is implemented.")
        self.size = size
        self.scale_factor = scale_factor
        self.mode = mode
        self.align_corners = align_corners  # accepted but irrelevant for nearest

    def __call__(self, x):
        return interpolate_nearest_2x(x)


if __name__ == "__main__":
    key = jax.random.PRNGKey(0)
    x = jax.random.normal(key, (2, 4, 16, 16), dtype=jnp.float32)

    mod = Interpolate(scale_factor=2, mode="nearest")
    out = mod(x)
    out = jax.block_until_ready(out)

    # Reference: PyTorch nearest 2x == element repeat along H and W.
    ref = jnp.repeat(jnp.repeat(x, 2, axis=2), 2, axis=3)

    assert out.shape == (2, 4, 32, 32), out.shape
    assert out.dtype == x.dtype
    assert jnp.array_equal(out, ref), "mismatch vs reference"

    print("KERNEL_OK")
</pallas_src>

<mosaic_0001>
module attributes {stable_mosaic.version = 11 : i64} {
  func.func @_interp_nearest2x_kernel(%arg0: i32, %arg1: i32, %arg2: memref<2x16x16xf32, #tpu.memory_space<vmem>>, %arg3: memref<2x16x64xf32, #tpu.memory_space<vmem>>) attributes {dimension_semantics = [#tpu.dimension_semantics<parallel>, #tpu.dimension_semantics<parallel>], iteration_bounds = array<i64: 4, 1>, scalar_prefetch = 0 : i64, scratch_operands = 0 : i64, tpu.core_type = #tpu.core_type<tc>, window_params = [{transform_indices = @transform_0, window_bounds = array<i64: 2, 16, 16>}, {transform_indices = @transform_1, window_bounds = array<i64: 2, 16, 64>}]} {
    %c0 = arith.constant 0 : index
    %c0_0 = arith.constant 0 : index
    %c0_1 = arith.constant 0 : index
    %0 = vector.load %arg2[%c0, %c0_0, %c0_1] : memref<2x16x16xf32, #tpu.memory_space<vmem>>, vector<2x16x16xf32>
    %1 = vector.shape_cast %0 : vector<2x16x16xf32> to vector<2x16x16x1xf32>
    %2 = vector.broadcast %1 : vector<2x16x16x1xf32> to vector<2x16x16x2xf32>
    %3 = vector.shape_cast %2 : vector<2x16x16x2xf32> to vector<2x16x32xf32>
    %4 = tpu.concatenate %3, %3 in 2 : vector<2x16x32xf32>, vector<2x16x32xf32> -> vector<2x16x64xf32>
    %c0_2 = arith.constant 0 : index
    %c0_3 = arith.constant 0 : index
    %c0_4 = arith.constant 0 : index
    %5 = vector.load %arg3[%c0_2, %c0_3, %c0_4] : memref<2x16x64xf32, #tpu.memory_space<vmem>>, vector<2x16x64xf32>
    tpu.vector_store %arg3[%c0_2, %c0_3, %c0_4], %4 {strides = array<i32>} : memref<2x16x64xf32, #tpu.memory_space<vmem>>, vector<2x16x64xf32>,
    return
  }
  func.func @transform_0(%arg0: i32, %arg1: i32) -> (i32, i32, i32) {
    %c0_i32 = arith.constant 0 : i32
    %c0_i32_0 = arith.constant 0 : i32
    return %arg0, %arg1, %c0_i32 : i32, i32, i32
  }
  func.func @transform_1(%arg0: i32, %arg1: i32) -> (i32, i32, i32) {
    %c0_i32 = arith.constant 0 : i32
    %c0_i32_0 = arith.constant 0 : i32
    return %arg0, %arg1, %c0_i32 : i32, i32, i32
  }
}

</mosaic_0001>

<bundles_post_ra>
// kernel: tpu_custom_call.1
= control target key start
LH: loop header
LB: loop body
LE: loop exit
PB: predicated region body
PF: predicated region fallthrough
CT: control target
= control target key end

     0   :  { %6 = vsyncpa [#allocation3], 0  ;;  %s3315_s0 = inlined_call_operand.hbm [shape: f32[8,16,16], index: 0, kind: input, shape index: {}]   ;;  %s3316_s1 = inlined_call_operand.hbm [shape: f32[8,16,64], index: 1, kind: output, shape index: {}]  }
   0x1   :  { %8 = vsyncpa [#allocation3 + $0x1], 0 }
   0x2   :  { %9 = vsyncpa [#allocation4], 0 }
   0x3   :  { %11 = vsyncpa [#allocation4 + $0x1], 0  ;;  %s2298_s6 = smov 0   ;;  %s2300_s7 = smov 0  }
   0x4   :  { %s2302_s8 = smov 0   ;;  %s2304_s9 = smov 0  }
   0x5   :  { %s2306_s10 = smov 0   ;;  %s2308_s11 = smov 0  }
   0x6 LB: > { %s2047_s12 = sadd.s32 4294967295, %s2263_s11   ;;  %s2048_s13 = sadd.s32 4294967294, %s2263_s11   ;;  %s2263_s11 = sphi %s2308_s11, %s17_s11   ;;  %s2259_s10 = sphi %s2306_s10, %s3376_s10   ;;  %s2255_s9 = sphi %s2304_s9, %s3375_s9   ;;  %s2251_s8 = sphi %s2302_s8, %s3374_s8   ;;  %s2247_s7 = sphi %s2300_s7, %s3373_s7   ;;  %s2243_s6 = sphi %s2298_s6, %s3372_s6  }
   0x7   : > { %s29_s14 = sadd.s32 1, %s2259_s10  ;;  %s38_s15 = sadd.s32 1, %s2251_s8 }
   0x8   : > { %p31_p0 = scmp.ge.s32.totalorder %s29_s14, 4  ;;  %p45_p1 = scmp.ne.s32.totalorder %s2251_s8, %s2247_s7 }
   0x9   : > { %p46_p2 = scmp.eq.s32.totalorder %s2263_s11, 0  ;;  %p51_p3 = scmp.ne.s32.totalorder %s2247_s7, %s2243_s6 }
   0xa   : > { %s3378_s14 = smov (%p31_p0, %s29_s14), 0  ;;  %p52_p5 = scmp.eq.s32.totalorder %s2047_s12, 0 }
   0xb   : > { %p2339_p4 = por %p46_p2, %p45_p1  ;;  %s33_s17 = ssub.s32 %s2259_s10, %s3378_s14 }
   0xc   : > { %p77_p6 = scmp.eq.s32.totalorder %s2047_s12, 3  ;;  %p36_p7 = scmp.eq.s32.totalorder %s33_s17, 0 }
   0xd   : > { %p2345_p8 = por %p52_p5, %p51_p3  ;;  %p83_p10 = scmp.eq.s32.totalorder %s2048_s13, 3 }
   0xe   : > { %p2349_p9 = por %p77_p6, %p45_p1  ;;  %p2080_p12 = scmp.lt.s32.totalorder %s2263_s11, 4 }
   0xf   : > { %s2354_s20 = scalar_select %p36_p7, %s2251_s8, %s38_s15  }
  0x10   : > { %s3334_s19 = scalar_select %p2349_p9, 1, 0 }
  0x11   : > { %p2356_p11 = por %p83_p10, %p51_p3  ;;  %s103_s22 = sand.u32 1, %s2251_s8  }
  0x12   : > { %s2051_s23 = sshll.u32 %s103_s22, 5  ;;  %s2065_s24 = sshll.u32 %s2259_s10, 9 }
  0x13   : > { %s3335_s21 = scalar_select %p2356_p11, 1, 0 }
  0x14   : > { %s2366_s27 = scalar_lea.hbm %s3315_s0, %s2065_s24  ;;  %s107_s28 = scalar_lea.vmem [#allocation2], %s2051_s23 }
  0x15   : > { %s117_s29 = sshll.u32 %s107_s28, 4  ;;  %p2372_p13 = pnand %p2080_p12, %p2339_p4  ;;  %s2368_s29 = int_to_ptr.vmem [resolvable:$true] %s117_s29 }
  0x16   : > { %s2377_s2 = scalar_lea.sflag [#allocation3], %s103_s22  ;;  %s2151_s3 = scalar_lea.hbm %s2366_s27, 512 }
  0x17   : > { %p2152_p1 = scmp.ne.s32.totalorder %s2366_s27, %s2151_s3  ;;  %p2153_p2 = pneg %p2372_p13 }
  0x18   : > { %s2156_s12 = scalar_lea.hbm %s3315_s0, 2048  ;;  %p2157_p4 = scmp.lt.u32.totalorder %s2366_s27, %s3315_s0 }
  0x19   : > { %p2154_p3 = pnand %p2153_p2, %p2152_p1  ;;  %p2158_p6 = scmp.lt.u32.totalorder %s2156_s12, %s2151_s3 }
  0x1a   : > { %p2160_p10 = scmp.lt.u32.totalorder %s2151_s3, %s2366_s27 }
  0x1b   : > { %p2155_p5 = pneg %p2154_p3  ;;  %p2159_p7 = por %p2158_p6, %p2157_p4 }
  0x1d   : > { %p2161_p12 = por %p2160_p10, %p2159_p7 }
  0x1f   : > { %p2162_p0 = pnand %p2161_p12, %p2155_p5 }
  0x21   : > { %2165 = shalt.err (!%p2162_p0)
}
  0x22   : > { %s2166_s16 = scalar_lea.vmem %s2368_s29, 512  ;;  %s2265_s17 = smov [#allocation2]  }
  0x23   : > { %p2167_p1 = scmp.ne.s32.totalorder %s2368_s29, %s2166_s16  ;;  %s2171_s22 = sshll.u32 %s2265_s17, 4  ;;  %s2172_s22 = int_to_ptr.vmem [resolvable:$false] %s2171_s22 }
  0x24   : > { %s2173_s23 = scalar_lea.vmem %s2172_s22, 1024  ;;  %p2174_p9 = scmp.lt.s32.totalorder %s2368_s29, %s2172_s22 }
  0x25   : > { %p2169_p3 = pnand %p2167_p1, %p2153_p2  ;;  %p2175_p4 = scmp.lt.s32.totalorder %s2173_s23, %s2166_s16 }
  0x27   : > { %p2170_p11 = pneg %p2169_p3  ;;  %p2176_p6 = por %p2175_p4, %p2174_p9 }
  0x29   : > { %p2177_p7 = pnand %p2176_p6, %p2170_p11 }
  0x2b   : > { %2180 = shalt.err (!%p2177_p7)
}
  0x2c   : > { %s2266_s24 = smov 128   ;;  %s2267_s25 = smov 8  }
  0x2d   : > { %2075 = dma.hbm_to_vmem [thread:$0]  (!%p2372_p13), %s2366_s27, 512, %s2368_s29, %s2377_s2, %s2266_s24, %s2266_s24, %s2267_s25  }
  0x2e   : > { %p125_p0 = scmp.lt.s32.totalorder %s2263_s11, 5  ;;  %p3337_p2 = scmp.ge.s32.totalorder %s2263_s11, 1 }
  0x30   : > { %p126_p5 = pnand %p3337_p2, %p125_p0 }
  0x32   : > { %129 = sbr.rel (%p126_p5) target bundleno = 641 (0x281), region = 24 }
  0x39   : > { %s2409_s26 = sand.u32 1, %s2247_s7  }
  0x3a   : > { %s2056_s28 = sshll.u32 %s2409_s26, 5  ;;  %s132_s3 = scalar_lea.sflag [#allocation3], %s2409_s26 }
  0x3b   : > { %s2415_s4 = scalar_lea.vmem [#allocation2], %s2056_s28 }
  0x3c   : > { %2234 = dma.done.wait (%p2345_p8), %s132_s3, 512  }
  0x3d   : > { %2236 = vsyncadd (%p2345_p8), %s132_s3, 4294966784  ;;  %v162_v0 = vlaneseq  ;;  %v158_v4 = vld [vmem:[%s2415_s4] sm:$0xff]  ;;  %v159_v19 = vld [vmem:[%s2415_s4 + $0x8] sm:$0xff]  ;;  %v2268_v56 = vmov 1983009808   ;;  %s2270_s18 = smov 2  }
  0x3e   : > { %v160_v28 = vld [vmem:[%s2415_s4 + $0x10] sm:$0xff]  ;;  %v161_v37 = vld [vmem:[%s2415_s4 + $0x18] sm:$0xff]  ;;  %v517_v57 = vunpack.c.l.s4 %v2268_v56  ;;  %v2269_v61 = vmov 1934713408   ;;  %s2271_s27 = smov 4   ;;  %s2272_s29 = smov 6  }
  0x3f   : > { %v2421_v1 = vshrl.u32 %v162_v0, 7  ;;  %v581_v62 = vunpack.c.l.s4 %v2269_v61  ;;  %s2273_s30 = smov 8   ;;  %s2274_s2 = smov 10   ;;  %vm1842_vm0 = vcmask 15360   ;;  %vm1847_vm1 = vcmask 31744  }
  0x40   : > { %v518_v60 = vunpack.c.0.s8 %v517_v57  ;;  %s2275_s5 = smov 12   ;;  %s2276_s12 = smov 14   ;;  %vm1852_vm2 = vcmask 48128   ;;  %vm1857_vm3 = vcmask 64512   ;;  %vm1862_vm4 = vcmask 80896  }
  0x41   : > { %v2424_v2 = vsub.s32 1, %v2421_v1  ;;  %v2427_v3 = vsub.s32 0, %v2421_v1  ;;  %v2433_v7 = vsub.s32 2, %v2421_v1  ;;  %v2437_v9 = vsub.s32 3, %v2421_v1  ;;  %s2277_s13 = smov 16   ;;  %s2278_s15 = smov 18  }
  0x42   : > { %v2441_v11 = vsub.s32 4, %v2421_v1  ;;  %v2445_v13 = vsub.s32 5, %v2421_v1  ;;  %v2449_v15 = vsub.s32 6, %v2421_v1  ;;  %v241_v17 = vsub.s32 7, %v2421_v1  ;;  %s2279_s16 = smov 20   ;;  %s2280_s17 = smov 22  }
  0x43   : > { %v176_v5 = vrot.slane %v158_v4, %v2424_v2  ;;  %v165_v6 = vrot.slane %v158_v4, %v2427_v3  ;;  %v187_v8 = vrot.slane %v158_v4, %v2433_v7  ;;  %v198_v10 = vrot.slane %v158_v4, %v2437_v9  ;;  %s2281_s22 = smov 24   ;;  %s2282_s23 = smov 26  }
  0x44   : > { %v209_v12 = vrot.slane %v158_v4, %v2441_v11  ;;  %v220_v14 = vrot.slane %v158_v4, %v2445_v13  ;;  %v231_v16 = vrot.slane %v158_v4, %v2449_v15  ;;  %v242_v18 = vrot.slane %v158_v4, %v241_v17  ;;  %s2283_s24 = smov 28   ;;  %s2284_s25 = smov 30  }
  0x45   : > { %178 = vbcast.lane.b32.xlu1 %v176_v5, 256  ;;  %167 = vbcast.lane.b32.xlu0 %v165_v6, 256  ;;  %v253_v20 = vrot.slane %v159_v19, %v2427_v3  ;;  %v264_v21 = vrot.slane %v159_v19, %v2424_v2  ;;  %v275_v22 = vrot.slane %v159_v19, %v2433_v7  ;;  %vm1867_vm5 = vcmask 97280   ;;  %s2285_s3 = smov 32   ;;  %s153_s4 = scalar_lea.vmem [#allocation5], %s2056_s28 }
  0x46   : > { %v286_v23 = vrot.slane %v159_v19, %v2437_v9  ;;  %v297_v24 = vrot.slane %v159_v19, %v2441_v11  ;;  %v308_v25 = vrot.slane %v159_v19, %v2445_v13  ;;  %v330_v26 = vrot.slane %v159_v19, %v241_v17  ;;  %p3370_p9 = scmp.ne.s32.totalorder %s3334_s19, 0 }
  0x47   : > { %v319_v27 = vrot.slane %v159_v19, %v2449_v15  ;;  %v352_v29 = vrot.slane %v160_v28, %v2424_v2  ;;  %v341_v30 = vrot.slane %v160_v28, %v2427_v3  ;;  %v374_v31 = vrot.slane %v160_v28, %v2437_v9 }
  0x48   : > { %v363_v32 = vrot.slane %v160_v28, %v2433_v7  ;;  %v396_v33 = vrot.slane %v160_v28, %v2445_v13  ;;  %v385_v34 = vrot.slane %v160_v28, %v2441_v11  ;;  %v418_v35 = vrot.slane %v160_v28, %v241_v17 }
  0x49   : > { %182 = vbcast.lane.b32.xlu1 %v176_v5, 264  ;;  %171 = vbcast.lane.b32.xlu0 %v165_v6, 264  ;;  %v407_v36 = vrot.slane %v160_v28, %v2449_v15  ;;  %v440_v38 = vrot.slane %v161_v37, %v2424_v2  ;;  %v429_v39 = vrot.slane %v161_v37, %v2427_v3  ;;  %v582_v5 = vunpack.c.0.s8 %v581_v62 }
  0x4a   : > { %v462_v40 = vrot.slane %v161_v37, %v2437_v9  ;;  %v451_v41 = vrot.slane %v161_v37, %v2433_v7  ;;  %v484_v42 = vrot.slane %v161_v37, %v2445_v13  ;;  %v473_v43 = vrot.slane %v161_v37, %v2441_v11 }
  0x4b   : > { %v506_v44 = vrot.slane %v161_v37, %v241_v17  ;;  %v495_v45 = vrot.slane %v161_v37, %v2449_v15  ;;  %v2508_v3 = vsub.s32 %v518_v60, %v2421_v1  ;;  %v2530_v13 = vsub.s32 %v582_v5, %v2421_v1 }
  0x4c   : > { %vm1872_vm6 = vcmask 113664   ;;  %vm1877_vm7 = vcmask 130048   ;;  %vm1882_vm8 = vcmask 146432   ;;  %vm1887_vm9 = vcmask 162816  }
  0x4d   : > { %193 = vbcast.lane.b32.xlu1 %v187_v8, 264  ;;  %189 = vbcast.lane.b32.xlu0 %v187_v8, 256  ;;  %vm1892_vm10 = vcmask 179200   ;;  %vm1897_vm11 = vcmask 195584   ;;  %vm1902_vm12 = vcmask 211968   ;;  %vm1907_vm13 = vcmask 228352  }
  0x4e   : > { %vm1912_vm14 = vcmask 244736   ;;  %vm1933_vm15 = vcmask 261120  }
  0x51   : > { %204 = vbcast.lane.b32.xlu1 %v198_v10, 264  ;;  %200 = vbcast.lane.b32.xlu0 %v198_v10, 256 }
  0x55   : > { %215 = vbcast.lane.b32.xlu1 %v209_v12, 264  ;;  %211 = vbcast.lane.b32.xlu0 %v209_v12, 256 }
  0x59   : > { %226 = vbcast.lane.b32.xlu1 %v220_v14, 264  ;;  %222 = vbcast.lane.b32.xlu0 %v220_v14, 256 }
  0x5d   : > { %237 = vbcast.lane.b32.xlu1 %v231_v16, 264  ;;  %233 = vbcast.lane.b32.xlu0 %v231_v16, 256 }
  0x61   : > { %248 = vbcast.lane.b32.xlu1 %v242_v18, 264  ;;  %244 = vbcast.lane.b32.xlu0 %v242_v18, 256 }
  0x65   : > { %259 = vbcast.lane.b32.xlu1 %v253_v20, 264  ;;  %255 = vbcast.lane.b32.xlu0 %v253_v20, 256 }
  0x69   : > { %270 = vbcast.lane.b32.xlu1 %v264_v21, 264  ;;  %266 = vbcast.lane.b32.xlu0 %v264_v21, 256 }
  0x6d   : > { %281 = vbcast.lane.b32.xlu1 %v275_v22, 264  ;;  %277 = vbcast.lane.b32.xlu0 %v275_v22, 256 }
  0x71   : > { %292 = vbcast.lane.b32.xlu1 %v286_v23, 264  ;;  %288 = vbcast.lane.b32.xlu0 %v286_v23, 256 }
  0x75   : > { %303 = vbcast.lane.b32.xlu1 %v297_v24, 264  ;;  %299 = vbcast.lane.b32.xlu0 %v297_v24, 256 }
  0x79   : > { %314 = vbcast.lane.b32.xlu1 %v308_v25, 264  ;;  %310 = vbcast.lane.b32.xlu0 %v308_v25, 256 }
  0x7d   : > { %332 = vbcast.lane.b32.xlu1 %v330_v26, 256  ;;  %321 = vbcast.lane.b32.xlu0 %v319_v27, 256 }
  0x81   : > { %354 = vbcast.lane.b32.xlu1 %v352_v29, 256  ;;  %343 = vbcast.lane.b32.xlu0 %v341_v30, 256 }
  0x85   : > { %376 = vbcast.lane.b32.xlu1 %v374_v31, 256  ;;  %365 = vbcast.lane.b32.xlu0 %v363_v32, 256 }
  0x89   : > { %398 = vbcast.lane.b32.xlu1 %v396_v33, 256  ;;  %387 = vbcast.lane.b32.xlu0 %v385_v34, 256 }
  0x8d   : > { %420 = vbcast.lane.b32.xlu1 %v418_v35, 256  ;;  %409 = vbcast.lane.b32.xlu0 %v407_v36, 256 }
  0x91   : > { %442 = vbcast.lane.b32.xlu1 %v440_v38, 256  ;;  %431 = vbcast.lane.b32.xlu0 %v429_v39, 256 }
  0x95   : > { %464 = vbcast.lane.b32.xlu1 %v462_v40, 256  ;;  %453 = vbcast.lane.b32.xlu0 %v451_v41, 256 }
  0x99   : > { %486 = vbcast.lane.b32.xlu1 %v484_v42, 256  ;;  %475 = vbcast.lane.b32.xlu0 %v473_v43, 256 }
  0x9d   : > { %508 = vbcast.lane.b32.xlu1 %v506_v44, 256  ;;  %497 = vbcast.lane.b32.xlu0 %v495_v45, 256 }
  0xa1   : > { %336 = vbcast.lane.b32.xlu1 %v330_v26, 264  ;;  %325 = vbcast.lane.b32.xlu0 %v319_v27, 264 }
  0xa5   : > { %358 = vbcast.lane.b32.xlu1 %v352_v29, 264  ;;  %347 = vbcast.lane.b32.xlu0 %v341_v30, 264 }
  0xa9   : > { %380 = vbcast.lane.b32.xlu1 %v374_v31, 264  ;;  %369 = vbcast.lane.b32.xlu0 %v363_v32, 264 }
  0xad   : > { %402 = vbcast.lane.b32.xlu1 %v396_v33, 264  ;;  %391 = vbcast.lane.b32.xlu0 %v385_v34, 264 }
  0xb1   : > { %424 = vbcast.lane.b32.xlu1 %v418_v35, 264  ;;  %413 = vbcast.lane.b32.xlu0 %v407_v36, 264 }
  0xb5   : > { %446 = vbcast.lane.b32.xlu1 %v440_v38, 264  ;;  %435 = vbcast.lane.b32.xlu0 %v429_v39, 264 }
  0xb7   : > { %v2477_v46 = vpop.permute.xlu1 %178  ;;  %v2479_v47 = vpop.permute.xlu0 %167 }
  0xb9   : > { %468 = vbcast.lane.b32.xlu1 %v462_v40, 264  ;;  %457 = vbcast.lane.b32.xlu0 %v451_v41, 264 }
  0xbb   : > { %v2481_v48 = vpop.permute.xlu1 %182  ;;  %v2483_v49 = vpop.permute.xlu0 %171 }
  0xbd   : > { %490 = vbcast.lane.b32.xlu1 %v484_v42, 264  ;;  %479 = vbcast.lane.b32.xlu0 %v473_v43, 264 }
  0xbf   : > { %v2485_v50 = vpop.permute.xlu1 %193  ;;  %v2487_v51 = vpop.permute.xlu0 %189 }
  0xc0   : > { %v514_v4 = vcombine.low %v2479_v47, %v2487_v51 }
  0xc1   : > { %512 = vbcast.lane.b32.xlu1 %v506_v44, 264  ;;  %501 = vbcast.lane.b32.xlu0 %v495_v45, 264 }
  0xc2   : > { %v2524_v11 = vrot.slane %v514_v4, %v2508_v3 }
  0xc3   : > { %v2489_v52 = vpop.permute.xlu1 %204  ;;  %v2491_v53 = vpop.permute.xlu0 %200 }
  0xc4   : > { %v530_v63 = vcombine.low %v2477_v46, %v2491_v53 }
  0xc6   : > { %v2513_v6 = vrot.slane %v530_v63, %v2508_v3 }
  0xc7   : > { %v2493_v54 = vpop.permute.xlu1 %215  ;;  %v2495_v55 = vpop.permute.xlu0 %211 }
  0xc8   : > { %v578_v14 = vcombine.low %v2524_v11, %v2513_v6 }
  0xca   : > { %v2548_v1 = vrot.slane %v578_v14, %v2530_v13 }
  0xcb   : > { %v2497_v58 = vpop.permute.xlu1 %226  ;;  %v2499_v59 = vpop.permute.xlu0 %222 }
  0xcc   : > { %3340 = vst [vmem:[#allocation10_spill] sm:$0xff] %v2548_v1 }
  0xcf   : > { %v2503_v0 = vpop.permute.xlu1 %237  ;;  %v2505_v2 = vpop.permute.xlu0 %233 }
  0xd0   : > { %v546_v7 = vcombine.low %v2495_v55, %v2505_v2 }
  0xd2   : > { %v2535_v15 = vrot.slane %v546_v7, %v2508_v3 }
  0xd3   : > { %v2517_v8 = vpop.permute.xlu1 %248  ;;  %v2519_v9 = vpop.permute.xlu0 %244 }
  0xd4   : > { %v562_v10 = vcombine.low %v2499_v59, %v2519_v9 }
  0xd6   : > { %v2527_v12 = vrot.slane %v562_v10, %v2508_v3 }
  0xd7   : > { %v2537_v16 = vpop.permute.xlu1 %259  ;;  %v2539_v17 = vpop.permute.xlu0 %255 }
  0xd8   : > { %3338 = vst [vmem:[#allocation8_spill] sm:$0xff] %v2537_v16  ;;  %v610_v18 = vcombine.low %v2535_v15, %v2527_v12 }
  0xda   : > { %v2551_v21 = vrot.slane %v610_v18, %v2530_v13 }
  0xdb   : > { %v2543_v19 = vpop.permute.xlu1 %270  ;;  %v2545_v20 = vpop.permute.xlu0 %266 }
  0xdc   : > { %3339 = vst [vmem:[#allocation9_spill] sm:$0xff] %v2543_v19  ;;  %3341 = vst [vmem:[#allocation11_spill] sm:$0xff] %v2551_v21  ;;  %v643_v22 = vcombine.high %v2548_v1, %v2551_v21 }
  0xde   : > { %1606 = vrot.lane.b32.xlu0 %v643_v22, %s2270_s18 }
  0xdf   : > { %v2558_v24 = vpop.permute.xlu1 %281  ;;  %v2560_v25 = vpop.permute.xlu0 %277 }
  0xe0   : > { %3342 = vst [vmem:[#allocation12_spill] sm:$0xff] %v2558_v24  ;;  %v650_v33 = vcombine.low %v2539_v17, %v2560_v25 }
  0xe2   : > { %v2590_v39 = vrot.slane %v650_v33, %v2508_v3 }
  0xe3   : > { %v2562_v26 = vpop.permute.xlu1 %292  ;;  %v2564_v27 = vpop.permute.xlu0 %288 }
  0xe4   : > { %v666_v30 = vcombine.low %v2545_v20, %v2564_v27 }
  0xe6   : > { %v2579_v34 = vrot.slane %v666_v30, %v2508_v3 }
  0xe7   : > { %v2566_v28 = vpop.permute.xlu1 %303  ;;  %v2568_v29 = vpop.permute.xlu0 %299 }
  0xe8   : > { %v714_v42 = vcombine.low %v2590_v39, %v2579_v34 }
  0xea   : > { %v2614_v61 = vrot.slane %v714_v42, %v2530_v13 }
  0xeb   : > { %v2572_v31 = vpop.permute.xlu1 %314  ;;  %v2574_v32 = vpop.permute.xlu0 %310 }
  0xec   : > { %3344 = vst [vmem:[#allocation14_spill] sm:$0xff] %v2614_v61 }
  0xef   : > { %v2581_v35 = vpop.permute.xlu1 %332  ;;  %v2583_v36 = vpop.permute.xlu0 %321 }
  0xf0   : > { %v698_v37 = vcombine.low %v2574_v32, %v2581_v35  ;;  %v682_v38 = vcombine.low %v2568_v29, %v2583_v36 }
  0xf2   : > { %v2593_v40 = vrot.slane %v698_v37, %v2508_v3  ;;  %v2596_v41 = vrot.slane %v682_v38, %v2508_v3 }
  0xf3   : > { %v2600_v43 = vpop.permute.xlu1 %354  ;;  %v2602_v44 = vpop.permute.xlu0 %343 }
  0xf4   : > { %v746_v45 = vcombine.low %v2596_v41, %v2593_v40 }
  0xf6   : > { %v2607_v56 = vrot.slane %v746_v45, %v2530_v13 }
  0xf7   : > { %v2609_v57 = vpop.permute.xlu1 %376  ;;  %v2611_v60 = vpop.permute.xlu0 %365 }
  0xf8   : > { %3343 = vst [vmem:[#allocation13_spill] sm:$0xff] %v2607_v56  ;;  %v779_v62 = vcombine.high %v2614_v61, %v2607_v56  ;;  %v1074_v63 = vcombine.low %v2600_v43, %v2609_v57  ;;  %v1058_v4 = vcombine.low %v2602_v44, %v2611_v60  ;;  %v579_v56 = vcombine.high %v2524_v11, %v2513_v6 }
  0xfa   : > { %1608 = vrot.lane.b32.xlu1 %v779_v62, %s2270_s18  ;;  %v1082_v14 = vrot.slane %v1074_v63, %v2508_v3  ;;  %v1066_v18 = vrot.slane %v1058_v4, %v2508_v3  ;;  %v611_v63 = vcombine.high %v2535_v15, %v2527_v12 }
  0xfb   : > { %v2623_v5 = vpop.permute.xlu1 %398  ;;  %v2625_v7 = vpop.permute.xlu0 %387 }
  0xfc   : > { %v1122_v45 = vcombine.low %v1066_v18, %v1082_v14  ;;  %v625_v16 = vrot.slane %v611_v63, %v2530_v13  ;;  %v1123_v6 = vcombine.high %v1066_v18, %v1082_v14  ;;  %v531_v14 = vcombine.high %v2477_v46, %v2491_v53 }
  0xff   : > { %v421_v22 = vpop.permute.xlu1 %420  ;;  %v410_v30 = vpop.permute.xlu0 %409 }
 0x100   : > { %v1106_v33 = vcombine.low %v2623_v5, %v421_v22  ;;  %v1090_v37 = vcombine.low %v2625_v7, %v410_v30 }
 0x102   : > { %v1114_v38 = vrot.slane %v1106_v33, %v2508_v3  ;;  %v1098_v42 = vrot.slane %v1090_v37, %v2508_v3  ;;  %v2651_v37 = vrot.slane %v1122_v45, %v2530_v13  ;;  %v563_v45 = vcombine.high %v2499_v59, %v2519_v9 }
 0x103   : > { %v2635_v62 = vpop.permute.xlu1 %442  ;;  %v2637_v23 = vpop.permute.xlu0 %431  ;;  %v1137_v9 = vrot.slane %v1123_v6, %v2530_v13 }
 0x104   : > { %v1154_v10 = vcombine.low %v1098_v42, %v1114_v38  ;;  %3346 = vst [vmem:[#allocation16_spill] sm:$0xff] %v2651_v37  ;;  %v1155_v21 = vcombine.high %v1098_v42, %v1114_v38  ;;  %v593_v38 = vrot.slane %v579_v56, %v2530_v13  ;;  %v547_v56 = vcombine.high %v2495_v55, %v2505_v2 }
 0x105   : > { %v2694_v53 = vrot.slane %v563_v45, %v2508_v3  ;;  %v1107_v55 = vcombine.high %v2623_v5, %v421_v22  ;;  %v1091_v2 = vcombine.high %v2625_v7, %v410_v30  ;;  %v1075_v45 = vcombine.high %v2600_v43, %v2609_v57 }
 0x106   : > { %v2642_v4 = vrot.slane %v1154_v10, %v2530_v13  ;;  %v644_v63 = vcombine.low %v593_v38, %v625_v16  ;;  %v1169_v24 = vrot.slane %v1155_v21, %v2530_v13  ;;  %v515_v21 = vcombine.high %v2479_v47, %v2487_v51 }
 0x107   : > { %v2646_v61 = vpop.permute.xlu1 %464  ;;  %v2648_v33 = vpop.permute.xlu0 %453  ;;  %v2703_v51 = vrot.slane %v531_v14, %v2508_v3  ;;  %v2706_v42 = vrot.slane %v547_v56, %v2508_v3  ;;  %v1059_v5 = vcombine.high %v2602_v44, %v2611_v60  ;;  %v747_v14 = vcombine.high %v2596_v41, %v2593_v40 }
 0x108   : > { %3345 = vst [vmem:[#allocation15_spill] sm:$0xff] %v2642_v4  ;;  %v1187_v1 = vcombine.high %v2651_v37, %v2642_v4  ;;  %v1210_v12 = vcombine.low %v2635_v62, %v2646_v61  ;;  %v1194_v15 = vcombine.low %v2637_v23, %v2648_v33  ;;  %v2718_v30 = vrot.slane %v515_v21, %v2508_v3 }
 0x109   : > { %v2725_v43 = vrot.slane %v1107_v55, %v2508_v3  ;;  %v2728_v44 = vrot.slane %v1091_v2, %v2508_v3  ;;  %v645_v57 = vcombine.high %v593_v38, %v625_v16  ;;  %v715_v60 = vcombine.high %v2590_v39, %v2579_v34 }
 0x10a   : > { %1610 = vrot.lane.b32.xlu0 %v1187_v1, %s2270_s18  ;;  %v2672_v19 = vrot.slane %v1210_v12, %v2508_v3  ;;  %v2675_v1 = vrot.slane %v1194_v15, %v2508_v3  ;;  %v1188_v15 = vcombine.low %v1137_v9, %v1169_v24  ;;  %v594_v40 = vcombine.low %v2718_v30, %v2703_v51 }
 0x10b   : > { %v2661_v11 = vpop.permute.xlu1 %486  ;;  %v2663_v10 = vpop.permute.xlu0 %475  ;;  %v2741_v41 = vrot.slane %v1075_v45, %v2508_v3  ;;  %v2744_v55 = vrot.slane %v1059_v5, %v2508_v3  ;;  %v761_v2 = vrot.slane %v747_v14, %v2530_v13 }
 0x10c   : > { %v1258_v6 = vcombine.low %v2675_v1, %v2672_v19  ;;  %v1259_v5 = vcombine.high %v2675_v1, %v2672_v19  ;;  %v683_v1 = vcombine.high %v2568_v29, %v2583_v36 }
 0x10d   : > { %v1138_v14 = vcombine.low %v2744_v55, %v2741_v41 }
 0x10e   : > { %1622 = vrot.lane.b32.xlu0 %v644_v63, %s2271_s27  ;;  %v2733_v21 = vrot.slane %v1258_v6, %v2530_v13  ;;  %v1189_v6 = vcombine.high %v1137_v9, %v1169_v24  ;;  %v602_v24 = vrot.slane %v594_v40, %v2530_v13  ;;  %v1273_v40 = vrot.slane %v1259_v5, %v2530_v13 }
 0x10f   : > { %v2682_v18 = vpop.permute.xlu1 %508  ;;  %v2684_v59 = vpop.permute.xlu0 %497  ;;  %v1146_v29 = vrot.slane %v1138_v14, %v2530_v13  ;;  %v1195_v14 = vcombine.high %v2637_v23, %v2648_v33  ;;  %v627_v23 = vcombine.high %v2706_v42, %v2694_v53 }
 0x110   : > { %v1242_v12 = vcombine.low %v2661_v11, %v2682_v18  ;;  %v1226_v46 = vcombine.low %v2663_v10, %v2684_v59  ;;  %3347 = vst [vmem:[#allocation17_spill] sm:$0xff] %v2733_v21 }
 0x112   : > { %v1250_v63 = vrot.slane %v1242_v12, %v2508_v3  ;;  %v1234_v47 = vrot.slane %v1226_v46, %v2508_v3  ;;  %1626 = vrot.lane.b32.xlu0 %v1188_v15, %s2271_s27  ;;  %v626_v12 = vcombine.low %v2706_v42, %v2694_v53  ;;  %v1170_v15 = vcombine.low %v2728_v44, %v2725_v43 }
 0x113   : > { %v2713_v7 = vpop.permute.xlu1 %336  ;;  %v2715_v22 = vpop.permute.xlu0 %325  ;;  %v1171_v42 = vcombine.high %v2728_v44, %v2725_v43 }
 0x114   : > { %v1290_v56 = vcombine.low %v1234_v47, %v1250_v63  ;;  %v1291_v39 = vcombine.high %v1234_v47, %v1250_v63  ;;  %v634_v45 = vrot.slane %v626_v12, %v2530_v13  ;;  %v699_v47 = vcombine.high %v2574_v32, %v2581_v35 }
 0x115   : > { %v1178_v32 = vrot.slane %v1170_v15, %v2530_v13  ;;  %v667_v35 = vcombine.high %v2545_v20, %v2564_v27  ;;  %v2793_v20 = vrot.slane %v683_v1, %v2508_v3  ;;  %v1243_v27 = vcombine.high %v2661_v11, %v2682_v18 }
 0x116   : > { %v2736_v46 = vrot.slane %v1290_v56, %v2530_v13  ;;  %1638 = vrot.lane.b32.xlu0 %v645_v57, %s2272_s29  ;;  %v729_v56 = vrot.slane %v715_v60, %v2530_v13  ;;  %v1305_v57 = vrot.slane %v1291_v39, %v2530_v13  ;;  %v646_v60 = vcombine.low %v602_v24, %v634_v45 }
 0x117   : > { %v2747_v16 = vpop.permute.xlu1 %358  ;;  %v2749_v34 = vpop.permute.xlu0 %347  ;;  %v1190_v15 = vcombine.low %v1146_v29, %v1178_v32  ;;  %v2800_v5 = vrot.slane %v667_v35, %v2508_v3  ;;  %v2831_v35 = vrot.slane %v1195_v14, %v2508_v3  ;;  %v802_v14 = vcombine.low %v2481_v48, %v2489_v52 }
 0x118   : > { %3348 = vst [vmem:[#allocation18_spill] sm:$0xff] %v2736_v46  ;;  %v1323_v38 = vcombine.high %v2733_v21, %v2736_v46  ;;  %v780_v12 = vcombine.low %v729_v56, %v761_v2 }
 0x11a   : > { %1612 = vrot.lane.b32.xlu1 %v1323_v38, %s2270_s18  ;;  %1642 = vrot.lane.b32.xlu0 %v1189_v6, %s2272_s29  ;;  %v651_v38 = vcombine.high %v2539_v17, %v2560_v25  ;;  %v2784_v6 = vrot.slane %v699_v47, %v2508_v3  ;;  %v1227_v17 = vcombine.high %v2663_v10, %v2684_v59  ;;  %s1960_s18 = sshll.u32 %s153_s4, 4  ;;  %s3259_s18 = int_to_ptr.vmem [resolvable:$true] %s1960_s18 }
 0x11b   : > { %v2769_v9 = vpop.permute.xlu1 %380  ;;  %v2771_v19 = vpop.permute.xlu0 %369  ;;  %v1324_v25 = vcombine.low %v1273_v40, %v1305_v57  ;;  %v1211_v47 = vcombine.high %v2635_v62, %v2646_v61  ;;  %v2814_v10 = vrot.slane %v1243_v27, %v2508_v3  ;;  %v781_v61 = vcombine.high %v729_v56, %v761_v2 }
 0x11c   : > { %v2808_v1 = vrot.slane %v651_v38, %v2508_v3  ;;  %v762_v11 = vcombine.low %v2793_v20, %v2784_v6  ;;  %v2817_v18 = vrot.slane %v1227_v17, %v2508_v3  ;;  %v647_v62 = vcombine.high %v602_v24, %v634_v45 }
 0x11d   : > { %v595_v2 = vcombine.high %v2718_v30, %v2703_v51  ;;  %v1325_v45 = vcombine.high %v1273_v40, %v1305_v57  ;;  %v1191_v24 = vcombine.high %v1146_v29, %v1178_v32  ;;  %v641_v38 = vrot.slane %v627_v23, %v2530_v13 }
 0x11e   : > { %1624 = vrot.lane.b32.xlu1 %v780_v12, %s2271_s27  ;;  %1654 = vrot.lane.b32.xlu0 %v646_v60, %s2273_s30  ;;  %v730_v12 = vcombine.low %v2808_v1, %v2800_v5  ;;  %v2828_v60 = vrot.slane %v1211_v47, %v2508_v3  ;;  %v1306_v53 = vcombine.low %v2817_v18, %v2814_v10 }
 0x11f   : > { %v2788_v36 = vpop.permute.xlu1 %402  ;;  %v2790_v39 = vpop.permute.xlu0 %391  ;;  %v770_v56 = vrot.slane %v762_v11, %v2530_v13  ;;  %v1139_v27 = vcombine.high %v2744_v55, %v2741_v41  ;;  %v609_v43 = vrot.slane %v595_v2, %v2530_v13  ;;  %v834_v32 = vcombine.low %v2497_v58, %v2517_v8 }
 0x120   : > { %v1274_v51 = vcombine.low %v2831_v35, %v2828_v60  ;;  %v738_v30 = vrot.slane %v730_v12, %v2530_v13  ;;  %v1185_v41 = vrot.slane %v1171_v42, %v2530_v13  ;;  %v1314_v55 = vrot.slane %v1306_v53, %v2530_v13 }
 0x121   : > { %v648_v29 = vcombine.low %v609_v43, %v641_v38  ;;  %v818_v17 = vcombine.low %v2493_v54, %v2503_v0  ;;  %v786_v47 = vcombine.low %v2483_v49, %v2485_v50  ;;  %v2870_v11 = vrot.slane %v834_v32, %v2508_v3 }
 0x122   : > { %1628 = vrot.lane.b32.xlu1 %v1324_v25, %s2271_s27  ;;  %1658 = vrot.lane.b32.xlu0 %v1190_v15, %s2273_s30  ;;  %v782_v40 = vcombine.low %v738_v30, %v770_v56  ;;  %v1153_v25 = vrot.slane %v1139_v27, %v2530_v13  ;;  %v1282_v15 = vrot.slane %v1274_v51, %v2530_v13  ;;  %s2067_s27 = sshll.u32 %s2255_s9, 9  ;;  %s2286_s9 = smov [#allocation5]  }
 0x123   : > { %v2821_v33 = vpop.permute.xlu1 %424  ;;  %v2823_v59 = vpop.permute.xlu0 %413  ;;  %v1330_v12 = vcombine.low %v2749_v34, %v2771_v19  ;;  %v2889_v27 = vrot.slane %v786_v47, %v2508_v3  ;;  %v2892_v51 = vrot.slane %v802_v14, %v2508_v3  ;;  %v783_v63 = vcombine.high %v738_v30, %v770_v56 }
 0x124   : > { %v1326_v23 = vcombine.low %v1282_v15, %v1314_v55  ;;  %v1378_v2 = vcombine.low %v2788_v36, %v2821_v33  ;;  %v1362_v42 = vcombine.low %v2790_v39, %v2823_v59  ;;  %v1327_v30 = vcombine.high %v1282_v15, %v1314_v55 }
 0x125   : > { %v970_v55 = vcombine.low %v2572_v31, %v2713_v7  ;;  %v954_v15 = vcombine.low %v2566_v28, %v2715_v22 }
 0x126   : > { %1640 = vrot.lane.b32.xlu1 %v781_v61, %s2272_s29  ;;  %1670 = vrot.lane.b32.xlu0 %v647_v62, %s2274_s2  ;;  %v1192_v61 = vcombine.low %v1153_v25, %v1185_v41  ;;  %v1346_v62 = vcombine.low %v2747_v16, %v2769_v9  ;;  %v2906_v47 = vrot.slane %v1378_v2, %v2508_v3 }
 0x127   : > { %v2851_v44 = vpop.permute.xlu1 %446  ;;  %v2853_v57 = vpop.permute.xlu0 %435  ;;  %v2909_v14 = vrot.slane %v1362_v42, %v2508_v3  ;;  %v2956_v46 = vrot.slane %v954_v15, %v2508_v3 }
 0x12a   : > { %1644 = vrot.lane.b32.xlu1 %v1325_v45, %s2272_s29  ;;  %1674 = vrot.lane.b32.xlu0 %v1191_v24, %s2274_s2  ;;  %v2885_v24 = vrot.slane %v818_v17, %v2508_v3  ;;  %v2900_v17 = vrot.slane %v1346_v62, %v2508_v3 }
 0x12b   : > { %v2880_v53 = vpop.permute.xlu1 %468  ;;  %v2882_v45 = vpop.permute.xlu0 %457 }
 0x12c   : > { %v882_v32 = vcombine.low %v2885_v24, %v2870_v11 }
 0x12e   : > { %1656 = vrot.lane.b32.xlu1 %v782_v40, %s2273_s30  ;;  %1686 = vrot.lane.b32.xlu0 %v648_v29, %s2275_s5  ;;  %v763_v40 = vcombine.high %v2793_v20, %v2784_v6  ;;  %v649_v29 = vcombine.high %v609_v43, %v641_v38  ;;  %v850_v6 = vcombine.low %v2889_v27, %v2892_v51 }
 0x12f   : > { %v1307_v20 = vcombine.high %v2817_v18, %v2814_v10  ;;  %v2919_v56 = vpop.permute.xlu1 %490  ;;  %v2921_v38 = vpop.permute.xlu0 %479  ;;  %v890_v43 = vrot.slane %v882_v32, %v2530_v13  ;;  %v1426_v10 = vcombine.low %v2909_v14, %v2906_v47  ;;  %v1193_v18 = vcombine.high %v1153_v25, %v1185_v41 }
 0x130   : > { %3349 = vst [vmem:[#allocation19_spill] sm:$0xff] %v2919_v56  ;;  %3350 = vst [vmem:[#allocation20_spill] sm:$0xff] %v2921_v38 }
 0x132   : > { %1660 = vrot.lane.b32.xlu1 %v1326_v23, %s2273_s30  ;;  %1690 = vrot.lane.b32.xlu0 %v1192_v61, %s2275_s5  ;;  %v2903_v23 = vrot.slane %v1330_v12, %v2508_v3  ;;  %v731_v61 = vcombine.high %v2808_v1, %v2800_v5  ;;  %v777_v5 = vrot.slane %v763_v40, %v2530_v13 }
 0x133   : > { %v2940_v2 = vpop.permute.xlu1 %512  ;;  %v2942_v41 = vpop.permute.xlu0 %501  ;;  %v1434_v40 = vrot.slane %v1426_v10, %v2530_v13  ;;  %v1466_v10 = vcombine.low %v2853_v57, %v2882_v45 }
 0x134   : > { %v1394_v1 = vcombine.low %v2903_v23, %v2900_v17  ;;  %v745_v62 = vrot.slane %v731_v61, %v2530_v13  ;;  %3351 = vst [vmem:[#allocation21_spill] sm:$0xff] %v2942_v41 }
 0x136   : > { %1672 = vrot.lane.b32.xlu1 %v783_v63, %s2274_s2  ;;  %1702 = vrot.lane.b32.xlu0 %v649_v29, %s2276_s12  ;;  %v1275_v63 = vcombine.high %v2831_v35, %v2828_v60  ;;  %v858_v60 = vrot.slane %v850_v6, %v2530_v13  ;;  %v1321_v35 = vrot.slane %v1307_v20, %v2530_v13  ;;  %v3352_v29 = vld [vmem:[#allocation9_spill] sm:$0xff]  ;;  %v3353_v6 = vld [vmem:[#allocation12_spill] sm:$0xff] }
 0x137   : > { %v784_v12 = vcombine.low %v745_v62, %v777_v5  ;;  %v1402_v32 = vrot.slane %v1394_v1, %v2530_v13  ;;  %v938_v61 = vcombine.low %v3352_v29, %v2562_v26  ;;  %v1482_v1 = vcombine.low %v2851_v44, %v2880_v53 }
 0x138   : > { %v914_v25 = vcombine.low %v858_v60, %v890_v43  ;;  %v1289_v42 = vrot.slane %v1275_v63, %v2530_v13  ;;  %v785_v37 = vcombine.high %v745_v62, %v777_v5  ;;  %v851_v5 = vcombine.high %v2889_v27, %v2892_v51 }
 0x139   : > { %v1458_v21 = vcombine.low %v1402_v32, %v1434_v40  ;;  %v2968_v15 = vrot.slane %v938_v61, %v2508_v3 }
 0x13a   : > { %1676 = vrot.lane.b32.xlu1 %v1327_v30, %s2274_s2  ;;  %1706 = vrot.lane.b32.xlu0 %v1193_v18, %s2276_s12  ;;  %v3354_v30 = vld [vmem:[#allocation8_spill] sm:$0xff]  ;;  %v2953_v18 = vrot.slane %v970_v55, %v2508_v3  ;;  %v1328_v63 = vcombine.low %v1289_v42, %v1321_v35  ;;  %v1498_v55 = vcombine.low %v2921_v38, %v2942_v41  ;;  %s3264_s2 = scalar_lea.hbm %s3316_s1, %s2067_s27 }
 0x13b   : > { %v922_v20 = vcombine.low %v3354_v30, %v3353_v6  ;;  %v2981_v38 = vrot.slane %v1466_v10, %v2508_v3  ;;  %v915_v41 = vcombine.high %v858_v60, %v890_v43  ;;  %v1329_v10 = vcombine.high %v1289_v42, %v1321_v35 }
 0x13c   : > { %v1018_v4 = vcombine.low %v2956_v46, %v2953_v18  ;;  %v1459_v43 = vcombine.high %v1402_v32, %v1434_v40  ;;  %v865_v60 = vrot.slane %v851_v5, %v2530_v13  ;;  %v819_v42 = vcombine.high %v2493_v54, %v2503_v0 }
 0x13d   : > { %v787_v32 = vcombine.high %v2483_v49, %v2485_v50  ;;  %v1347_v40 = vcombine.high %v2747_v16, %v2769_v9  ;;  %v1331_v54 = vcombine.high %v2749_v34, %v2771_v19  ;;  %v1379_v49 = vcombine.high %v2788_v36, %v2821_v33 }
 0x13e   : > { %1688 = vrot.lane.b32.xlu1 %v784_v12, %s2275_s5  ;;  %1718 = vrot.lane.b32.xlu0 %v914_v25, %s2277_s13  ;;  %v1514_v12 = vcombine.low %v2919_v56, %v2940_v2  ;;  %v2972_v25 = vrot.slane %v922_v20, %v2508_v3  ;;  %v2978_v56 = vrot.slane %v1482_v1, %v2508_v3 }
 0x13f   : > { %v883_v20 = vcombine.high %v2885_v24, %v2870_v11  ;;  %v1026_v11 = vrot.slane %v1018_v4, %v2530_v13  ;;  %v1395_v24 = vcombine.high %v2903_v23, %v2900_v17  ;;  %v835_v4 = vcombine.high %v2497_v58, %v2517_v8 }
 0x140   : > { %v2984_v61 = vrot.slane %v1514_v12, %v2508_v3  ;;  %v1530_v62 = vcombine.low %v2981_v38, %v2978_v56  ;;  %v803_v58 = vcombine.high %v2481_v48, %v2489_v52  ;;  %v1363_v48 = vcombine.high %v2790_v39, %v2823_v59 }
 0x141   : > { %v897_v27 = vrot.slane %v883_v20, %v2530_v13  ;;  %v3026_v8 = vrot.slane %v835_v4, %v2508_v3  ;;  %v3037_v0 = vrot.slane %v819_v42, %v2508_v3  ;;  %v3356_v20 = vld [vmem:[#allocation11_spill] sm:$0xff]  ;;  %v3047_v34 = vrot.slane %v787_v32, %v2508_v3  ;;  %v3360_v42 = vld [vmem:[#allocation20_spill] sm:$0xff] }
 0x142   : > { %1692 = vrot.lane.b32.xlu1 %v1328_v63, %s2275_s5  ;;  %1722 = vrot.lane.b32.xlu0 %v1458_v21, %s2277_s13  ;;  %v2987_v63 = vrot.slane %v1498_v55, %v2508_v3  ;;  %v986_v21 = vcombine.low %v2972_v25, %v2968_v15  ;;  %v1538_v17 = vrot.slane %v1530_v62, %v2530_v13  ;;  %v3355_v55 = vld [vmem:[#allocation10_spill] sm:$0xff]  ;;  %s1944_s5 = scalar_lea.sflag [#allocation4], %s2409_s26 }
 0x143   : > { %v3050_v9 = vrot.slane %v803_v58, %v2508_v3  ;;  %v898_v19 = vcombine.low %v3037_v0, %v3026_v8  ;;  %v1019_v36 = vcombine.high %v2956_v46, %v2953_v18  ;;  %v917_v39 = vcombine.high %v865_v60, %v897_v27 }
 0x144   : > { %v1562_v1 = vcombine.low %v2987_v63, %v2984_v61  ;;  %v994_v51 = vrot.slane %v986_v21, %v2530_v13  ;;  %v3357_v21 = vcombine.low %v3355_v55, %v3356_v20  ;;  %v3058_v59 = vrot.slane %v1347_v40, %v2508_v3 }
 0x145   : > { %v3061_v5 = vrot.slane %v1331_v54, %v2508_v3  ;;  %v3064_v62 = vrot.slane %v1379_v49, %v2508_v3  ;;  %v866_v46 = vcombine.low %v3047_v34, %v3050_v9  ;;  %v1033_v18 = vrot.slane %v1019_v36, %v2530_v13 }
 0x146   : > { %1704 = vrot.lane.b32.xlu1 %v785_v37, %s2276_s12  ;;  %1734 = vrot.lane.b32.xlu0 %v915_v41, %s2278_s15  ;;  %v1427_v37 = vcombine.high %v2909_v14, %v2906_v47  ;;  %v1050_v35 = vcombine.low %v994_v51, %v1026_v11  ;;  %v1570_v23 = vrot.slane %v1562_v1, %v2530_v13 }
 0x147   : > { %v1409_v47 = vrot.slane %v1395_v24, %v2530_v13  ;;  %v916_v41 = vcombine.low %v865_v60, %v897_v27  ;;  %v1051_v33 = vcombine.high %v994_v51, %v1026_v11  ;;  %v3067_v1 = vrot.slane %v1363_v48, %v2508_v3 }
 0x148   : > { %v1441_v14 = vrot.slane %v1427_v37, %v2530_v13  ;;  %v1594_v12 = vcombine.low %v1538_v17, %v1570_v23  ;;  %v1531_v11 = vcombine.high %v2981_v38, %v2978_v56  ;;  %v1563_v24 = vcombine.high %v2987_v63, %v2984_v61 }
 0x149   : > { %v1595_v37 = vcombine.high %v1538_v17, %v1570_v23  ;;  %v906_v27 = vrot.slane %v898_v19, %v2530_v13  ;;  %v971_v56 = vcombine.high %v2572_v31, %v2713_v7  ;;  %v955_v38 = vcombine.high %v2566_v28, %v2715_v22 }
 0x14a   : > { %1708 = vrot.lane.b32.xlu1 %v1329_v10, %s2276_s12  ;;  %1738 = vrot.lane.b32.xlu0 %v1459_v43, %s2278_s15  ;;  %v1460_v52 = vcombine.low %v1409_v47, %v1441_v14  ;;  %v987_v10 = vcombine.high %v2972_v25, %v2968_v15  ;;  %v1410_v15 = vcombine.low %v3061_v5, %v3058_v59  ;;  %s2181_s12 = scalar_lea.vmem %s3259_s18, 512 }
 0x14b   : > { %v1442_v25 = vcombine.low %v3067_v1, %v3064_v62  ;;  %v1461_v43 = vcombine.high %v1409_v47, %v1441_v14  ;;  %v874_v61 = vrot.slane %v866_v46, %v2530_v13  ;;  %v1545_v63 = vrot.slane %v1531_v11, %v2530_v13  ;;  %v3362_v46 = vld [vmem:[#allocation13_spill] sm:$0xff]  ;;  %p2182_p8 = scmp.ne.s32.totalorder %s3259_s18, %s2181_s12 }
 0x14c   : > { %v1001_v51 = vrot.slane %v987_v10, %v2530_v13  ;;  %v1577_v60 = vrot.slane %v1563_v24, %v2530_v13  ;;  %v939_v31 = vcombine.high %v3352_v29, %v2562_v26  ;;  %v923_v28 = vcombine.high %v3354_v30, %v3353_v6  ;;  %v3358_v26 = vld [vmem:[#allocation19_spill] sm:$0xff]  ;;  %v3361_v10 = vld [vmem:[#allocation14_spill] sm:$0xff] }
 0x14d   : > { %v1450_v17 = vrot.slane %v1442_v25, %v2530_v13  ;;  %v918_v23 = vcombine.low %v874_v61, %v906_v27  ;;  %v985_v7 = vrot.slane %v971_v56, %v2508_v3  ;;  %v969_v22 = vrot.slane %v955_v38, %v2508_v3  ;;  %p2183_p11 = pnand %p2182_p8, %p3370_p9 }
 0x14e   : > { %1720 = vrot.lane.b32.xlu1 %v1050_v35, %s2277_s13  ;;  %1750 = vrot.lane.b32.xlu0 %v916_v41, %s2279_s16  ;;  %v1052_v4 = vcombine.low %v1001_v51, %v1033_v18  ;;  %v1418_v35 = vrot.slane %v1410_v15, %v2530_v13  ;;  %v1483_v47 = vcombine.high %v2851_v44, %v2880_v53  ;;  %v3359_v41 = vld [vmem:[#allocation21_spill] sm:$0xff] }
 0x14f   : > { %v1467_v14 = vcombine.high %v2853_v57, %v2882_v45  ;;  %v1515_v29 = vcombine.high %v3358_v26, %v2940_v2  ;;  %v1499_v32 = vcombine.high %v3360_v42, %v3359_v41  ;;  %v1596_v6 = vcombine.low %v1545_v63, %v1577_v60  ;;  %p2184_p13 = pneg %p2183_p11 }
 0x150   : > { %v1607_v50 = vpop.permute.xlu0 %1606  ;;  %v1462_v30 = vcombine.low %v1418_v35, %v1450_v17  ;;  %v953_v58 = vrot.slane %v939_v31, %v2508_v3  ;;  %v937_v44 = vrot.slane %v923_v28, %v2508_v3  ;;  %v1034_v53 = vcombine.low %v969_v22, %v985_v7  ;;  %v3364_v31 = vld [vmem:[#allocation16_spill] sm:$0xff]  ;;  %v3365_v28 = vld [vmem:[#allocation15_spill] sm:$0xff] }
 0x151   : > { %v3043_v16 = vsel %vm1842_vm0, %v3357_v21, %v1607_v50  ;;  %v1053_v40 = vcombine.high %v1001_v51, %v1033_v18  ;;  %v1497_v57 = vrot.slane %v1483_v47, %v2508_v3  ;;  %v1481_v45 = vrot.slane %v1467_v14, %v2508_v3 }
 0x152   : > { %1724 = vrot.lane.b32.xlu1 %v1594_v12, %s2277_s13  ;;  %1754 = vrot.lane.b32.xlu0 %v1460_v52, %s2279_s16  ;;  %v1529_v2 = vrot.slane %v1515_v29, %v2508_v3  ;;  %v1513_v12 = vrot.slane %v1499_v32, %v2508_v3  ;;  %v899_v54 = vcombine.high %v3037_v0, %v3026_v8  ;;  %s2185_s13 = sshll.u32 %s2286_s9, 4  ;;  %s2186_s13 = int_to_ptr.vmem [resolvable:$false] %s2185_s13 }
 0x153   : > { %v919_v49 = vcombine.high %v874_v61, %v906_v27  ;;  %v1002_v48 = vcombine.low %v937_v44, %v953_v58  ;;  %v867_v50 = vcombine.high %v3047_v34, %v3050_v9  ;;  %v1042_v52 = vrot.slane %v1034_v53, %v2530_v13  ;;  %p2188_p10 = scmp.lt.s32.totalorder %s3259_s18, %s2186_s13 }
 0x154   : > { %v1546_v55 = vcombine.low %v1481_v45, %v1497_v57  ;;  %v1578_v20 = vcombine.low %v1513_v12, %v1529_v2  ;;  %v1597_v21 = vcombine.high %v1545_v63, %v1577_v60  ;;  %v1411_v3 = vcombine.high %v3061_v5, %v3058_v59 }
 0x155   : > { %v1443_v8 = vcombine.high %v3067_v1, %v3064_v62  ;;  %v1463_v0 = vcombine.high %v1418_v35, %v1450_v17  ;;  %v913_v19 = vrot.slane %v899_v54, %v2530_v13  ;;  %v1010_v34 = vrot.slane %v1002_v48, %v2530_v13 }
 0x156   : > { %1736 = vrot.lane.b32.xlu1 %v1051_v33, %s2278_s15  ;;  %1766 = vrot.lane.b32.xlu0 %v917_v39, %s2280_s17  ;;  %v881_v9 = vrot.slane %v867_v50, %v2530_v13  ;;  %v1554_v36 = vrot.slane %v1546_v55, %v2530_v13  ;;  %v1586_v39 = vrot.slane %v1578_v20, %v2530_v13 }
 0x157   : > { %v1054_v33 = vcombine.low %v1010_v34, %v1042_v52  ;;  %v1425_v59 = vrot.slane %v1411_v3, %v2530_v13  ;;  %v1457_v5 = vrot.slane %v1443_v8, %v2530_v13  ;;  %v3363_v18 = vcombine.low %v3361_v10, %v3362_v46 }
 0x158   : > { %v920_v1 = vcombine.low %v881_v9, %v913_v19  ;;  %v1598_v24 = vcombine.low %v1554_v36, %v1586_v39  ;;  %v1035_v15 = vcombine.high %v969_v22, %v985_v7  ;;  %v1055_v25 = vcombine.high %v1010_v34, %v1042_v52 }
 0x159   : > { %v1003_v27 = vcombine.high %v937_v44, %v953_v58  ;;  %v1547_v56 = vcombine.high %v1481_v45, %v1497_v57  ;;  %v1579_v38 = vcombine.high %v1513_v12, %v1529_v2  ;;  %v1599_v61 = vcombine.high %v1554_v36, %v1586_v39  ;;  %v3367_v58 = vld [vmem:[#allocation17_spill] sm:$0xff]  ;;  %v3368_v44 = vld [vmem:[#allocation18_spill] sm:$0xff] }
 0x15a   : > { %1740 = vrot.lane.b32.xlu1 %v1595_v37, %s2278_s15  ;;  %1770 = vrot.lane.b32.xlu0 %v1461_v43, %s2280_s17  ;;  %v1464_v37 = vcombine.low %v1425_v59, %v1457_v5  ;;  %v921_v43 = vcombine.high %v881_v9, %v913_v19  ;;  %v1049_v51 = vrot.slane %v1035_v15, %v2530_v13  ;;  %s2187_s15 = scalar_lea.vmem %s2186_s13, 1024 }
 0x15b   : > { %v1465_v63 = vcombine.high %v1425_v59, %v1457_v5  ;;  %v1017_v60 = vrot.slane %v1003_v27, %v2530_v13  ;;  %v1593_v35 = vrot.slane %v1579_v38, %v2530_v13  ;;  %v3366_v7 = vcombine.low %v3364_v31, %v3365_v28  ;;  %p2189_p12 = scmp.lt.s32.totalorder %s2187_s15, %s2181_s12 }
 0x15c   : > { %v3369_v53 = vcombine.low %v3367_v58, %v3368_v44 }
 0x15d   : > { %v1056_v17 = vcombine.low %v1017_v60, %v1049_v51  ;;  %v1057_v29 = vcombine.high %v1017_v60, %v1049_v51  ;;  %p2190_p1 = por %p2189_p12, %p2188_p10 }
 0x15e   : > { %1752 = vrot.lane.b32.xlu1 %v1052_v4, %s2279_s16  ;;  %1782 = vrot.lane.b32.xlu0 %v918_v23, %s2281_s22  ;;  %v1561_v4 = vrot.slane %v1547_v56, %v2530_v13 }
 0x15f   : > { %p2191_p3 = pnand %p2190_p1, %p2184_p13 }
 0x160   : > { %v1600_v47 = vcombine.low %v1561_v4, %v1593_v35  ;;  %v1601_v42 = vcombine.high %v1561_v4, %v1593_v35 }
 0x162   : > { %1756 = vrot.lane.b32.xlu1 %v1596_v6, %s2279_s16  ;;  %1786 = vrot.lane.b32.xlu0 %v1462_v30, %s2281_s22 }
 0x166   : > { %1768 = vrot.lane.b32.xlu1 %v1053_v40, %s2280_s17  ;;  %1798 = vrot.lane.b32.xlu0 %v919_v49, %s2282_s23 }
 0x16a   : > { %1772 = vrot.lane.b32.xlu1 %v1597_v21, %s2280_s17  ;;  %1802 = vrot.lane.b32.xlu0 %v1463_v0, %s2282_s23 }
 0x16c   : > { %v1609_v62 = vpop.permute.xlu1 %1608 }
 0x16d   : > { %v1844_v11 = vsel %vm1842_vm0, %v3363_v18, %v1609_v62 }
 0x16e   : > { %1784 = vrot.lane.b32.xlu1 %v1054_v33, %s2281_s22  ;;  %1814 = vrot.lane.b32.xlu0 %v920_v1, %s2283_s24 }
 0x172   : > { %1788 = vrot.lane.b32.xlu1 %v1598_v24, %s2281_s22  ;;  %1818 = vrot.lane.b32.xlu0 %v1464_v37, %s2283_s24 }
 0x176   : > { %1800 = vrot.lane.b32.xlu1 %v1055_v25, %s2282_s23  ;;  %1830 = vrot.lane.b32.xlu0 %v921_v43, %s2284_s25 }
 0x17a   : > { %1804 = vrot.lane.b32.xlu1 %v1599_v61, %s2282_s23  ;;  %1834 = vrot.lane.b32.xlu0 %v1465_v63, %s2284_s25 }
 0x17c   : > { %v1611_v23 = vpop.permute.xlu0 %1610 }
 0x17d   : > { %v1845_v22 = vsel %vm1842_vm0, %v3366_v7, %v1611_v23 }
 0x17e   : > { %1816 = vrot.lane.b32.xlu1 %v1056_v17, %s2283_s24 }
 0x180   : > { %v1623_v14 = vpop.permute.xlu0 %1622 }
 0x181   : > { %v1848_v26 = vsel %vm1847_vm1, %v3043_v16, %v1623_v14 }
 0x182   : > { %1820 = vrot.lane.b32.xlu1 %v1600_v47, %s2283_s24 }
 0x184   : > { %v1627_v41 = vpop.permute.xlu0 %1626 }
 0x185   : > { %v1850_v13 = vsel %vm1847_vm1, %v1845_v22, %v1627_v41 }
 0x186   : > { %1832 = vrot.lane.b32.xlu1 %v1057_v29, %s2284_s25 }
 0x188   : > { %v1639_v32 = vpop.permute.xlu0 %1638 }
 0x189   : > { %v1853_v6 = vsel %vm1852_vm2, %v1848_v26, %v1639_v32 }
 0x18a   : > { %1836 = vrot.lane.b32.xlu1 %v1601_v42, %s2284_s25 }
 0x18c   : > { %v1613_v30 = vpop.permute.xlu1 %1612  ;;  %v1643_v16 = vpop.permute.xlu0 %1642 }
 0x18d   : > { %v1846_v40 = vsel %vm1842_vm0, %v3369_v53, %v1613_v30  ;;  %v1855_v57 = vsel %vm1852_vm2, %v1850_v13, %v1643_v16  ;;  %vm1938_vm0 = vcmask 523264  }
 0x190   : > { %v1625_v45 = vpop.permute.xlu1 %1624  ;;  %v1655_v12 = vpop.permute.xlu0 %1654 }
 0x191   : > { %v1849_v2 = vsel %vm1847_vm1, %v1844_v11, %v1625_v45  ;;  %v1858_v54 = vsel %vm1857_vm3, %v1853_v6, %v1655_v12 }
 0x194   : > { %v1629_v49 = vpop.permute.xlu1 %1628  ;;  %v1659_v50 = vpop.permute.xlu0 %1658 }
 0x195   : > { %v1851_v48 = vsel %vm1847_vm1, %v1846_v40, %v1629_v49  ;;  %v1860_v52 = vsel %vm1857_vm3, %v1855_v57, %v1659_v50 }
 0x198   : > { %v1641_v55 = vpop.permute.xlu1 %1640  ;;  %v1671_v21 = vpop.permute.xlu0 %1670 }
 0x199   : > { %v1854_v20 = vsel %vm1852_vm2, %v1849_v2, %v1641_v55  ;;  %v1863_v3 = vsel %vm1862_vm4, %v1858_v54, %v1671_v21 }
 0x19c   : > { %v1645_v8 = vpop.permute.xlu1 %1644  ;;  %v1675_v19 = vpop.permute.xlu0 %1674 }
 0x19d   : > { %v1856_v0 = vsel %vm1852_vm2, %v1851_v48, %v1645_v8  ;;  %v1865_v34 = vsel %vm1862_vm4, %v1860_v52, %v1675_v19 }
 0x1a0   : > { %v1657_v9 = vpop.permute.xlu1 %1656  ;;  %v1687_v39 = vpop.permute.xlu0 %1686 }
 0x1a1   : > { %v1859_v36 = vsel %vm1857_vm3, %v1854_v20, %v1657_v9  ;;  %v1868_v13 = vsel %vm1867_vm5, %v1863_v3, %v1687_v39 }
 0x1a4   : > { %v1661_v33 = vpop.permute.xlu1 %1660  ;;  %v1691_v5 = vpop.permute.xlu0 %1690 }
 0x1a5   : > { %v1861_v59 = vsel %vm1857_vm3, %v1856_v0, %v1661_v33  ;;  %v1870_v44 = vsel %vm1867_vm5, %v1865_v34, %v1691_v5 }
 0x1a8   : > { %v1673_v62 = vpop.permute.xlu1 %1672  ;;  %v1703_v10 = vpop.permute.xlu0 %1702 }
 0x1a9   : > { %v3181_v1 = vsel %vm1862_vm4, %v1859_v36, %v1673_v62  ;;  %v1873_v32 = vsel %vm1872_vm6, %v1868_v13, %v1703_v10 }
 0x1ac   : > { %v1677_v46 = vpop.permute.xlu1 %1676  ;;  %v1707_v11 = vpop.permute.xlu0 %1706 }
 0x1ad   : > { %v3184_v18 = vsel %vm1862_vm4, %v1861_v59, %v1677_v46  ;;  %v1875_v16 = vsel %vm1872_vm6, %v1870_v44, %v1707_v11 }
 0x1b0   : > { %v3186_v24 = vpop.permute.xlu1 %1688  ;;  %v1719_v37 = vpop.permute.xlu0 %1718 }
 0x1b1   : > { %v1878_v6 = vsel %vm1877_vm7, %v1873_v32, %v1719_v37  ;;  %v1869_v9 = vsel %vm1867_vm5, %v3181_v1, %v3186_v24 }
 0x1b4   : > { %v3188_v15 = vpop.permute.xlu1 %1692  ;;  %v1723_v25 = vpop.permute.xlu0 %1722 }
 0x1b5   : > { %v1880_v45 = vsel %vm1877_vm7, %v1875_v16, %v1723_v25  ;;  %v1871_v5 = vsel %vm1867_vm5, %v3184_v18, %v3188_v15 }
 0x1b8   : > { %v3190_v43 = vpop.permute.xlu1 %1704  ;;  %v1735_v27 = vpop.permute.xlu0 %1734 }
 0x1b9   : > { %v1883_v30 = vsel %vm1882_vm8, %v1878_v6, %v1735_v27  ;;  %v1874_v39 = vsel %vm1872_vm6, %v1869_v9, %v3190_v43 }
 0x1bc   : > { %v3192_v51 = vpop.permute.xlu1 %1708  ;;  %v1739_v56 = vpop.permute.xlu0 %1738 }
 0x1bd   : > { %v1885_v12 = vsel %vm1882_vm8, %v1880_v45, %v1739_v56  ;;  %v1876_v46 = vsel %vm1872_vm6, %v1871_v5, %v3192_v51 }
 0x1c0   : > { %v1721_v38 = vpop.permute.xlu1 %1720  ;;  %v1751_v61 = vpop.permute.xlu0 %1750 }
 0x1c1   : > { %v1888_v53 = vsel %vm1887_vm9, %v1883_v30, %v1751_v61  ;;  %v1879_v33 = vsel %vm1877_vm7, %v1874_v39, %v1721_v38 }
 0x1c4   : > { %v3194_v63 = vpop.permute.xlu1 %1724  ;;  %v1755_v60 = vpop.permute.xlu0 %1754 }
 0x1c5   : > { %v1890_v48 = vsel %vm1887_vm9, %v1885_v12, %v1755_v60  ;;  %v1881_v11 = vsel %vm1877_vm7, %v1876_v46, %v3194_v63 }
 0x1c8   : > { %v1737_v4 = vpop.permute.xlu1 %1736  ;;  %v1767_v35 = vpop.permute.xlu0 %1766 }
 0x1c9   : > { %v1893_v57 = vsel %vm1892_vm10, %v1888_v53, %v1767_v35  ;;  %v1884_v59 = vsel %vm1882_vm8, %v1879_v33, %v1737_v4 }
 0x1cc   : > { %v3196_v17 = vpop.permute.xlu1 %1740  ;;  %v1771_v23 = vpop.permute.xlu0 %1770 }
 0x1cd   : > { %v1895_v55 = vsel %vm1892_vm10, %v1890_v48, %v1771_v23  ;;  %v1886_v37 = vsel %vm1882_vm8, %v1881_v11, %v3196_v17 }
 0x1d0   : > { %v1753_v31 = vpop.permute.xlu1 %1752  ;;  %v1783_v28 = vpop.permute.xlu0 %1782 }
 0x1d1   : > { %v1898_v2 = vsel %vm1897_vm11, %v1893_v57, %v1783_v28  ;;  %v1889_v62 = vsel %vm1887_vm9, %v1884_v59, %v1753_v31 }
 0x1d4   : > { %v1757_v7 = vpop.permute.xlu1 %1756  ;;  %v1787_v22 = vpop.permute.xlu0 %1786 }
 0x1d5   : > { %v1900_v21 = vsel %vm1897_vm11, %v1895_v55, %v1787_v22  ;;  %v1891_v18 = vsel %vm1887_vm9, %v1886_v37, %v1757_v7 }
 0x1d8   : > { %v1769_v47 = vpop.permute.xlu1 %1768  ;;  %v1799_v14 = vpop.permute.xlu0 %1798 }
 0x1d9   : > { %v1903_v54 = vsel %vm1902_vm12, %v1898_v2, %v1799_v14  ;;  %v1894_v1 = vsel %vm1892_vm10, %v1889_v62, %v1769_v47 }
 0x1dc   : > { %v1773_v26 = vpop.permute.xlu1 %1772  ;;  %v1803_v29 = vpop.permute.xlu0 %1802 }
 0x1dd   : > { %v1905_v3 = vsel %vm1902_vm12, %v1900_v21, %v1803_v29  ;;  %v1896_v27 = vsel %vm1892_vm10, %v1891_v18, %v1773_v26 }
 0x1e0   : > { %v1785_v41 = vpop.permute.xlu1 %1784  ;;  %v1815_v42 = vpop.permute.xlu0 %1814 }
 0x1e1   : > { %v1908_v50 = vsel %vm1907_vm13, %v1903_v54, %v1815_v42  ;;  %v1899_v24 = vsel %vm1897_vm11, %v1894_v1, %v1785_v41 }
 0x1e4   : > { %v1789_v58 = vpop.permute.xlu1 %1788  ;;  %v1819_v40 = vpop.permute.xlu0 %1818 }
 0x1e5   : > { %v1910_v0 = vsel %vm1907_vm13, %v1905_v3, %v1819_v40  ;;  %v1901_v56 = vsel %vm1897_vm11, %v1896_v27, %v1789_v58 }
 0x1e8   : > { %v1801_v49 = vpop.permute.xlu1 %1800  ;;  %v1831_v52 = vpop.permute.xlu0 %1830 }
 0x1e9   : > { %v1913_v20 = vsel %vm1912_vm14, %v1908_v50, %v1831_v52  ;;  %v1904_v25 = vsel %vm1902_vm12, %v1899_v24, %v1801_v49 }
 0x1ea   : > { %1921 = vrot.lane.b32.xlu0 %v1913_v20, %s2285_s3 }
 0x1ec   : > { %v1805_v8 = vpop.permute.xlu1 %1804  ;;  %v1835_v19 = vpop.permute.xlu0 %1834 }
 0x1ed   : > { %v1915_v34 = vsel %vm1912_vm14, %v1910_v0, %v1835_v19  ;;  %v1906_v38 = vsel %vm1902_vm12, %v1901_v56, %v1805_v8 }
 0x1ee   : > { %1925 = vrot.lane.b32.xlu0 %v1915_v34, %s2285_s3 }
 0x1f0   : > { %v1817_v36 = vpop.permute.xlu1 %1816 }
 0x1f1   : > { %v1909_v15 = vsel %vm1907_vm13, %v1904_v25, %v1817_v36 }
 0x1f4   : > { %v1821_v10 = vpop.permute.xlu1 %1820 }
 0x1f5   : > { %v1911_v61 = vsel %vm1907_vm13, %v1906_v38, %v1821_v10 }
 0x1f8   : > { %v1833_v43 = vpop.permute.xlu1 %1832 }
 0x1f9   : > { %v1914_v51 = vsel %vm1912_vm14, %v1909_v15, %v1833_v43 }
 0x1fa   : > { %1923 = vrot.lane.b32.xlu1 %v1914_v51, %s2285_s3 }
 0x1fc   : > { %v1837_v63 = vpop.permute.xlu1 %1836 }
 0x1fd   : > { %v1916_v60 = vsel %vm1912_vm14, %v1911_v61, %v1837_v63 }
 0x1fe   : > { %1927 = vrot.lane.b32.xlu1 %v1916_v60, %s2285_s3 }
 0x25c   : > { %v1922_v4 = vpop.permute.xlu0 %1921 }
 0x25d   : > { %v1934_v35 = vsel %vm1933_vm15, %v1913_v20, %v1922_v4 }
 0x25e   : > { %1939 = vst.msk [vmem:[%s153_s4] sm:$0xff] %vm1938_vm0, %v1934_v35 }
 0x260   : > { %v1926_v17 = vpop.permute.xlu0 %1925 }
 0x261   : > { %v1936_v23 = vsel %vm1933_vm15, %v1915_v34, %v1926_v17 }
 0x262   : > { %1941 = vst.msk [vmem:[%s153_s4 + $0x10] sm:$0xff] %vm1938_vm0, %v1936_v23 }
 0x26c   : > { %v1924_v31 = vpop.permute.xlu1 %1923 }
 0x26d   : > { %v1935_v28 = vsel %vm1933_vm15, %v1914_v51, %v1924_v31 }
 0x26e   : > { %1940 = vst.msk [vmem:[%s153_s4 + $0x8] sm:$0xff] %vm1938_vm0, %v1935_v28 }
 0x270   : > { %v1928_v7 = vpop.permute.xlu1 %1927 }
 0x271   : > { %v1937_v22 = vsel %vm1933_vm15, %v1916_v60, %v1928_v7 }
 0x272   : > { %1942 = vst.msk [vmem:[%s153_s4 + $0x18] sm:$0xff] %vm1938_vm0, %v1937_v22 }
 0x273   : > { %2194 = shalt.err (!%p2191_p3)
}
 0x274   : > { %s2195_s16 = scalar_lea.hbm %s3264_s2, 512  ;;  %s2199_s23 = scalar_lea.hbm %s3316_s1, 2048 }
 0x275   : > { %p2196_p4 = scmp.ne.s32.totalorder %s3264_s2, %s2195_s16  ;;  %p2200_p0 = scmp.lt.u32.totalorder %s3264_s2, %s3316_s1 }
 0x276   : > { %p2201_p2 = scmp.lt.u32.totalorder %s2199_s23, %s2195_s16  ;;  %p2203_p8 = scmp.lt.u32.totalorder %s2195_s16, %s3264_s2 }
 0x277   : > { %p2197_p6 = pnand %p2196_p4, %p3370_p9 }
 0x278   : > { %p2202_p5 = por %p2201_p2, %p2200_p0 }
 0x279   : > { %p2198_p7 = pneg %p2197_p6 }
 0x27a   : > { %p2204_p11 = por %p2203_p8, %p2202_p5 }
 0x27c   : > { %p2205_p13 = pnand %p2204_p11, %p2198_p7 }
 0x27e   : > { %2208 = shalt.err (!%p2205_p13)
}
 0x27f   : > { %s2287_s3 = smov 128  }
 0x280   : > { %2070 = dma.vmem_to_hbm [thread:$0]  (%p3370_p9), %s3259_s18, 512, %s3264_s2, %s1944_s5, %s2287_s3, %s2287_s3, %s2273_s30  }
 0x281 PF: > { %p2081_p10 = scmp.ge.s32.totalorder %s2263_s11, 2  ;;  %s1975_s4 = sand.u32 1, %s2243_s6  }
 0x282   : > { %p3371_p12 = scmp.ne.s32.totalorder %s3335_s21, 0  ;;  %s1976_s27 = scalar_lea.sflag [#allocation4], %s1975_s4 }
 0x284   : > { %p2077_p1 = pnand %p2081_p10, %p3371_p12 }
 0x286   : > { %2238 = dma.done.wait (!%p2077_p1), %s1976_s27, 512  }
 0x287   : > { %2240 = vsyncadd (!%p2077_p1), %s1976_s27, 4294966784  ;;  %s17_s11 = sadd.s32 1, %s2263_s11   ;;  %s3372_s6 = smov %s2247_s7 }
 0x288   : > { %p14_p3 = scmp.ge.s32.totalorder %s17_s11, 6   ;;  %s3373_s7 = smov %s2251_s8 }
 0x289   : > { %s3374_s8 = smov %s2354_s20  ;;  %s3375_s9 = smov %s2259_s10 }
 0x28a   : > { %s3376_s10 = smov %s3378_s14  ;;  %16 = sbr.rel (!%p14_p3) target bundleno = 6 (0x6), region = 69 }
 0x291   :  { %1981 = vsyncpa [#allocation3], 1 }
 0x292   :  { %1983 = vsyncpa [#allocation3 + $0x1], 1 }
 0x293   :  { %1984 = vsyncpa [#allocation4], 1 }
 0x294   :  { %1986 = vsyncpa [#allocation4 + $0x1], 1 }

</bundles_post_ra>
